<compile_context>
chip_gen: v7x
topology: tpu7x:2x2x1
jax: 0.10.0
libtpu: 0.0.40
codegen_flags: <defaults>
</compile_context>

<pallas_src>
import jax
import jax.numpy as jnp
from jax.experimental import pallas as pl
from jax.experimental.pallas import tpu as pltpu

LANE = 128   # lane width: batch lives on the lane axis
D_IN = 2     # input features (unpadded)
H1 = 16      # fc1 width
H2 = 32      # fc2 width
D_OUT = 1    # single logit row (unpadded)


def _mlp_kernel(x_ref, w1_ref, b1_ref, w2_ref, b2_ref, w3t_ref, b3_ref, o_ref):
    # Feature-major: x_ref is [2, TN] (features x batch-tile); h = W @ x + b.
    x = x_ref[...]                                   # [2, TN]
    w1 = w1_ref[...]                                 # [16, 2]
    # fc1: K=2 -> two broadcast FMAs on the VPU (not worth the MXU).
    h1 = w1[:, 0:1] * x[0:1, :] + w1[:, 1:2] * x[1:2, :] + b1_ref[...]
    h1 = jnp.maximum(h1, 0.0)                        # [16, TN]
    # fc2 on the MXU.
    h2 = jnp.dot(w2_ref[...], h1, preferred_element_type=jnp.float32)  # [32, TN]
    h2 = jnp.maximum(h2 + b2_ref[...], 0.0)
    # fc3: single output row -> lane-broadcast mul + sublane reduction (XLU).
    z = jnp.sum(w3t_ref[...] * h2, axis=0, keepdims=True)             # [1, TN]
    o_ref[...] = jax.nn.sigmoid(z + b3_ref[...])


def _round_up(v, m):
    return ((v + m - 1) // m) * m


def circle_classifier_forward(x, params, *, batch_tile=32768):
    """x: [N, 2] float32. params: dict name -> (w [out,in], b [out]) in PyTorch
    layout. Returns [N, 1] float32 (sigmoid probabilities)."""
    n = x.shape[0]
    n_lanes = _round_up(max(n, 1), LANE)
    # >=2 grid steps when the batch is big enough so v7x's two TensorCores
    # both get work; then pick a balanced tile so the last step isn't mostly
    # padding.  Tiles are multiples of 128 (lane-dense, unmasked stores).
    min_steps = 2 if n >= 2 * LANE else 1
    tile_cap = max(LANE, min(batch_tile, n_lanes))
    n_steps = max(min_steps, pl.cdiv(n_lanes, tile_cap))
    tn = _round_up(pl.cdiv(n_lanes, n_steps), LANE)
    n_steps = max(min_steps, pl.cdiv(n_lanes, tn))
    n_pad = n_steps * tn

    # Feature-major input slab [2, n_pad]; only the batch axis is padded.
    x_t = jnp.pad(x.astype(jnp.float32).T, ((0, 0), (0, n_pad - n)))

    w1, b1 = params["fc1"]
    w2, b2 = params["fc2"]
    w3, b3 = params["fc3"]
    w1p = w1.astype(jnp.float32)                        # [16, 2]
    b1p = b1.astype(jnp.float32).reshape(H1, 1)         # [16, 1]
    w2p = w2.astype(jnp.float32)                        # [32, 16]
    b2p = b2.astype(jnp.float32).reshape(H2, 1)         # [32, 1]
    w3t = w3.astype(jnp.float32).reshape(D_OUT, H2).T   # [32, 1]
    b3p = b3.astype(jnp.float32).reshape(D_OUT, 1)      # [1, 1]

    const = lambda shape: pl.BlockSpec(shape, lambda i: (0, 0))  # VMEM-resident

    out_p = pl.pallas_call(
        _mlp_kernel,
        out_shape=jax.ShapeDtypeStruct((D_OUT, n_pad), jnp.float32),
        grid=(n_steps,),
        in_specs=[
            pl.BlockSpec((D_IN, tn), lambda i: (0, i)),   # x tile (batch on lanes)
            const((H1, D_IN)),                            # w1 [16, 2]
            const((H1, 1)),                               # b1
            const((H2, H1)),                              # w2 [32, 16]
            const((H2, 1)),                               # b2
            const((H2, D_OUT)),                           # w3^T [32, 1]
            const((D_OUT, 1)),                            # b3
        ],
        out_specs=pl.BlockSpec((D_OUT, tn), lambda i: (0, i)),
        compiler_params=pltpu.CompilerParams(
            dimension_semantics=("parallel",),
            vmem_limit_bytes=32 * 1024 * 1024,
        ),
    )(x_t, w1p, b1p, w2p, b2p, w3t, b3p)

    # Row 0 of the [1, n_pad] slab holds the probabilities; drop batch padding.
    return out_p[0, :n].reshape(n, 1)


def init_params(key):
    """Deterministic synthetic init matching nn.Linear shapes (w:[out,in], b:[out])."""
    dims = [("fc1", 2, 16), ("fc2", 16, 32), ("fc3", 32, 1)]
    params = {}
    for name, fan_in, fan_out in dims:
        key, kw, kb = jax.random.split(key, 3)
        bound = 1.0 / (fan_in ** 0.5)
        w = jax.random.uniform(kw, (fan_out, fan_in), jnp.float32, -bound, bound)
        b = jax.random.uniform(kb, (fan_out,), jnp.float32, -bound, bound)
        params[name] = (w, b)
    return params


def _reference(x, params):
    h = x
    for name in ("fc1", "fc2"):
        w, b = params[name]
        h = jnp.maximum(h @ w.T + b, 0.0)
    w, b = params["fc3"]
    return jax.nn.sigmoid(h @ w.T + b)


if __name__ == "__main__":
    key = jax.random.PRNGKey(0)
    key, kx1, kx2 = jax.random.split(key, 3)
    params = init_params(key)

    # Small case (single grid step).
    x_small = jax.random.normal(kx1, (8, 2), jnp.float32)
    out_small = jax.block_until_ready(circle_classifier_forward(x_small, params))
    ref_small = _reference(x_small, params)
    assert out_small.shape == (8, 1), out_small.shape
    assert jnp.allclose(out_small, ref_small, atol=1e-5, rtol=1e-5)

    # Multi-tile case (grid=(3,), batch padded 300 -> 384) to exercise the
    # pipelined batch grid, the >=2-step rule, and padding slice-off.
    x_big = jax.random.normal(kx2, (300, 2), jnp.float32)
    out_big = jax.block_until_ready(
        circle_classifier_forward(x_big, params, batch_tile=128))
    ref_big = _reference(x_big, params)
    assert out_big.shape == (300, 1), out_big.shape
    assert jnp.allclose(out_big, ref_big, atol=1e-5, rtol=1e-5)

    # Default-tile path (balanced 2-step split of the batch).
    out_def = jax.block_until_ready(circle_classifier_forward(x_big, params))
    assert jnp.allclose(out_def, ref_big, atol=1e-5, rtol=1e-5)

    print("KERNEL_OK")
</pallas_src>

<mosaic_0001>
module attributes {stable_mosaic.version = 11 : i64} {
  func.func @_mlp_kernel(%arg0: i32, %arg1: memref<2x128xf32, #tpu.memory_space<vmem>>, %arg2: memref<16x2xf32, #tpu.memory_space<vmem>>, %arg3: memref<16x1xf32, #tpu.memory_space<vmem>>, %arg4: memref<32x16xf32, #tpu.memory_space<vmem>>, %arg5: memref<32x1xf32, #tpu.memory_space<vmem>>, %arg6: memref<32x1xf32, #tpu.memory_space<vmem>>, %arg7: memref<1x1xf32, #tpu.memory_space<vmem>>, %arg8: memref<1x128xf32, #tpu.memory_space<vmem>>) attributes {dimension_semantics = [#tpu.dimension_semantics<parallel>], iteration_bounds = array<i64: 1>, scalar_prefetch = 0 : i64, scratch_operands = 0 : i64, tpu.core_type = #tpu.core_type<tc>, window_params = [{transform_indices = @transform_0, window_bounds = array<i64: 2, 128>}, {pipeline_mode = #tpu.pipeline_mode<synchronous>, transform_indices = @transform_1, window_bounds = array<i64: 16, 2>}, {pipeline_mode = #tpu.pipeline_mode<synchronous>, transform_indices = @transform_2, window_bounds = array<i64: 16, 1>}, {pipeline_mode = #tpu.pipeline_mode<synchronous>, transform_indices = @transform_3, window_bounds = array<i64: 32, 16>}, {pipeline_mode = #tpu.pipeline_mode<synchronous>, transform_indices = @transform_4, window_bounds = array<i64: 32, 1>}, {pipeline_mode = #tpu.pipeline_mode<synchronous>, transform_indices = @transform_5, window_bounds = array<i64: 32, 1>}, {pipeline_mode = #tpu.pipeline_mode<synchronous>, transform_indices = @transform_6, window_bounds = array<i64: 1, 1>}, {transform_indices = @transform_7, window_bounds = array<i64: 1, 128>}]} {
    %c0 = arith.constant 0 : index
    %c0_0 = arith.constant 0 : index
    %0 = vector.load %arg1[%c0, %c0_0] : memref<2x128xf32, #tpu.memory_space<vmem>>, vector<2x128xf32>
    %c0_1 = arith.constant 0 : index
    %c0_2 = arith.constant 0 : index
    %1 = vector.load %arg2[%c0_1, %c0_2] : memref<16x2xf32, #tpu.memory_space<vmem>>, vector<16x2xf32>
    %2 = vector.extract_strided_slice %1 {offsets = [0, 0], sizes = [16, 1], strides = [1, 1]} : vector<16x2xf32> to vector<16x1xf32>
    %3 = vector.extract_strided_slice %0 {offsets = [0, 0], sizes = [1, 128], strides = [1, 1]} : vector<2x128xf32> to vector<1x128xf32>
    %4 = vector.broadcast %2 : vector<16x1xf32> to vector<16x128xf32>
    %5 = vector.broadcast %3 : vector<1x128xf32> to vector<16x128xf32>
    %6 = arith.mulf %4, %5 : vector<16x128xf32>
    %7 = vector.extract_strided_slice %1 {offsets = [0, 1], sizes = [16, 1], strides = [1, 1]} : vector<16x2xf32> to vector<16x1xf32>
    %8 = vector.extract_strided_slice %0 {offsets = [1, 0], sizes = [1, 128], strides = [1, 1]} : vector<2x128xf32> to vector<1x128xf32>
    %9 = vector.broadcast %7 : vector<16x1xf32> to vector<16x128xf32>
    %10 = vector.broadcast %8 : vector<1x128xf32> to vector<16x128xf32>
    %11 = arith.mulf %9, %10 : vector<16x128xf32>
    %12 = arith.addf %6, %11 : vector<16x128xf32>
    %c0_3 = arith.constant 0 : index
    %c0_4 = arith.constant 0 : index
    %13 = vector.load %arg3[%c0_3, %c0_4] : memref<16x1xf32, #tpu.memory_space<vmem>>, vector<16x1xf32>
    %14 = vector.broadcast %13 : vector<16x1xf32> to vector<16x128xf32>
    %15 = arith.addf %12, %14 : vector<16x128xf32>
    %cst = arith.constant 0.000000e+00 : f32
    %16 = vector.broadcast %cst : f32 to vector<16x128xf32>
    %17 = arith.maximumf %15, %16 : vector<16x128xf32>
    %c0_5 = arith.constant 0 : index
    %c0_6 = arith.constant 0 : index
    %18 = vector.load %arg4[%c0_5, %c0_6] : memref<32x16xf32, #tpu.memory_space<vmem>>, vector<32x16xf32>
    %cst_7 = arith.constant dense<0.000000e+00> : vector<32x128xf32>
    %19 = tpu.matmul %18, %17, %cst_7 {dimension_numbers = #tpu.dot_dimension_numbers<[1], [0], [0], [1], [0, 0, 1, 1], [], []>} : vector<32x16xf32>, vector<16x128xf32>, vector<32x128xf32> -> vector<32x128xf32>
    %c0_8 = arith.constant 0 : index
    %c0_9 = arith.constant 0 : index
    %20 = vector.load %arg5[%c0_8, %c0_9] : memref<32x1xf32, #tpu.memory_space<vmem>>, vector<32x1xf32>
    %21 = vector.broadcast %20 : vector<32x1xf32> to vector<32x128xf32>
    %22 = arith.addf %19, %21 : vector<32x128xf32>
    %cst_10 = arith.constant 0.000000e+00 : f32
    %23 = vector.broadcast %cst_10 : f32 to vector<32x128xf32>
    %24 = arith.maximumf %22, %23 : vector<32x128xf32>
    %c0_11 = arith.constant 0 : index
    %c0_12 = arith.constant 0 : index
    %25 = vector.load %arg6[%c0_11, %c0_12] : memref<32x1xf32, #tpu.memory_space<vmem>>, vector<32x1xf32>
    %26 = vector.broadcast %25 : vector<32x1xf32> to vector<32x128xf32>
    %27 = arith.mulf %26, %24 : vector<32x128xf32>
    %cst_13 = arith.constant dense<0.000000e+00> : vector<128xf32>
    %28 = vector.multi_reduction <add>, %27, %cst_13 [0] : vector<32x128xf32> to vector<128xf32>
    %29 = vector.shape_cast %28 : vector<128xf32> to vector<1x128xf32>
    %c0_14 = arith.constant 0 : index
    %c0_15 = arith.constant 0 : index
    %30 = vector.load %arg7[%c0_14, %c0_15] : memref<1x1xf32, #tpu.memory_space<vmem>>, vector<1x1xf32>
    %31 = vector.broadcast %30 : vector<1x1xf32> to vector<1x128xf32>
    %32 = arith.addf %29, %31 : vector<1x128xf32>
    %33 = arith.negf %32 : vector<1x128xf32>
    %34 = math.exp %33 : vector<1x128xf32>
    %cst_16 = arith.constant 1.000000e+00 : f32
    %35 = vector.broadcast %cst_16 : f32 to vector<1x128xf32>
    %36 = arith.addf %35, %34 : vector<1x128xf32>
    %37 = arith.divf %35, %36 : vector<1x128xf32>
    %c0_17 = arith.constant 0 : index
    %c0_18 = arith.constant 0 : index
    %38 = vector.load %arg8[%c0_17, %c0_18] : memref<1x128xf32, #tpu.memory_space<vmem>>, vector<1x128xf32>
    tpu.vector_store %arg8[%c0_17, %c0_18], %37 {strides = array<i32>} : memref<1x128xf32, #tpu.memory_space<vmem>>, vector<1x128xf32>,
    return
  }
  func.func @transform_0(%arg0: i32) -> (i32, i32) {
    %c0_i32 = arith.constant 0 : i32
    %c0_i32_0 = arith.constant 0 : i32
    return %c0_i32, %arg0 : i32, i32
  }
  func.func @transform_1(%arg0: i32) -> (i32, i32) {
    %c0_i32 = arith.constant 0 : i32
    %c0_i32_0 = arith.constant 0 : i32
    %c0_i32_1 = arith.constant 0 : i32
    return %c0_i32, %c0_i32_0 : i32, i32
  }
  func.func @transform_2(%arg0: i32) -> (i32, i32) {
    %c0_i32 = arith.constant 0 : i32
    %c0_i32_0 = arith.constant 0 : i32
    %c0_i32_1 = arith.constant 0 : i32
    return %c0_i32, %c0_i32_0 : i32, i32
  }
  func.func @transform_3(%arg0: i32) -> (i32, i32) {
    %c0_i32 = arith.constant 0 : i32
    %c0_i32_0 = arith.constant 0 : i32
    %c0_i32_1 = arith.constant 0 : i32
    return %c0_i32, %c0_i32_0 : i32, i32
  }
  func.func @transform_4(%arg0: i32) -> (i32, i32) {
    %c0_i32 = arith.constant 0 : i32
    %c0_i32_0 = arith.constant 0 : i32
    %c0_i32_1 = arith.constant 0 : i32
    return %c0_i32, %c0_i32_0 : i32, i32
  }
  func.func @transform_5(%arg0: i32) -> (i32, i32) {
    %c0_i32 = arith.constant 0 : i32
    %c0_i32_0 = arith.constant 0 : i32
    %c0_i32_1 = arith.constant 0 : i32
    return %c0_i32, %c0_i32_0 : i32, i32
  }
  func.func @transform_6(%arg0: i32) -> (i32, i32) {
    %c0_i32 = arith.constant 0 : i32
    %c0_i32_0 = arith.constant 0 : i32
    %c0_i32_1 = arith.constant 0 : i32
    return %c0_i32, %c0_i32_0 : i32, i32
  }
  func.func @transform_7(%arg0: i32) -> (i32, i32) {
    %c0_i32 = arith.constant 0 : i32
    %c0_i32_0 = arith.constant 0 : i32
    return %c0_i32, %arg0 : i32, i32
  }
}

</mosaic_0001>

<bundles_post_ra>
// kernel: tpu_custom_call.1
= control target key start
LH: loop header
LB: loop body
LE: loop exit
PB: predicated region body
PF: predicated region fallthrough
CT: control target
= control target key end

     0   :  { %s457_s0 = inlined_call_operand.vmem [shape: f32[2,128], index: 0, kind: input, shape index: {}]   ;;  %s458_s1 = inlined_call_operand.vmem [shape: f32[16,2], index: 1, kind: input, shape index: {}]   ;;  %s459_s2 = inlined_call_operand.vmem [shape: f32[16,1], index: 2, kind: input, shape index: {}]   ;;  %s460_s3 = inlined_call_operand.vmem [shape: f32[32,16], index: 3, kind: input, shape index: {}]   ;;  %s461_s4 = inlined_call_operand.vmem [shape: f32[32,1], index: 4, kind: input, shape index: {}]   ;;  %s462_s5 = inlined_call_operand.vmem [shape: f32[32,1], index: 5, kind: input, shape index: {}]   ;;  %s463_s6 = inlined_call_operand.<no memory space> [shape: f32[1,1], index: 6, kind: input, shape index: {}]   ;;  %s464_s7 = inlined_call_operand.hbm [shape: f32[1,128], index: 7, kind: output, shape index: {}]  }
   0x1   :  { %v12_v0 = vstv %s463_s6 }
   0x2   :  { %13 = vst [vmem:[#allocation2] sm:$0x1] %v12_v0 }
   0x3   :  { %v30_v1 = vld [vmem:[%s458_s1] sm:$0xff]  ;;  %v340_v2 = vmov 1   ;;  %v341_v3 = vmov 0   ;;  %v31_v4 = vld [vmem:[%s458_s1 + $0x8] sm:$0xff] }
   0x4   :  { %310 = vset.pattern.permute.xlu1 %v340_v2  ;;  %309 = vset.pattern.permute.xlu0 %v341_v3 }
   0x5   :  { %49 = vperm.xlu1 %310, %v30_v1   ;;  %34 = vperm.xlu0 %309, %v30_v1  }
   0x6   :  { %14 = vsyncpa [#allocation4], 0  ;;  %v64_v5 = vld [vmem:[%s459_s2] sm:$0xff]  ;;  %v65_v6 = vld [vmem:[%s459_s2 + $0x8] sm:$0xff]  ;;  %vm108_vm0 = vcmask 130048   ;;  %v42_v18 = vlaneseq }
   0x7   :  { %v84_v7 = vld [vmem:[%s461_s4] sm:$0xff]  ;;  %v85_v8 = vld [vmem:[%s461_s4 + $0x8] sm:$0xff]  ;;  %v86_v9 = vld [vmem:[%s461_s4 + $0x10] sm:$0xff] }
   0x8   :  { %v87_v10 = vld [vmem:[%s461_s4 + $0x18] sm:$0xff]  ;;  %v80_v11 = vld [vmem:[%s460_s3] sm:$0xff]  ;;  %v82_v12 = vld [vmem:[%s460_s3 + $0x10] sm:$0xff]  ;;  %v430_v19 = vshrl.u32 %v42_v18, 7 }
   0x9   :  { %53 = vperm.xlu1 %310, %v31_v4   ;;  %39 = vperm.xlu0 %309, %v31_v4   ;;  %v210_v13 = vld [vmem:[%s462_s5] sm:$0xff]  ;;  %v211_v14 = vld [vmem:[%s462_s5 + $0x8] sm:$0xff]  ;;  %v212_v15 = vld [vmem:[%s462_s5 + $0x10] sm:$0xff] }
   0xa   :  { %294 = vmatprep.mubr.msk.f32.mxu0 %vm108_vm0, %v80_v11  ;;  %297 = vmatprep.mubr.msk.f32.mxu1 %vm108_vm0, %v82_v12  ;;  %v213_v16 = vld [vmem:[%s462_s5 + $0x18] sm:$0xff]  ;;  %v247_v17 = vld [vmem:[#allocation2] sm:$0x1]  ;;  %v58_v20 = vsub.s32 1, %v430_v19  ;;  %v44_v21 = vsub.s32 0, %v430_v19  ;;  %v81_v42 = vld [vmem:[%s460_s3 + $0x8] sm:$0xff] }
   0xb   :  { %v29_v22 = vld [vmem:[%s457_s0] sm:$0x3]  ;;  %v83_v43 = vld [vmem:[%s460_s3 + $0x18] sm:$0xff]  ;;  %s342_s3 = smov [#allocation3]  }
   0xc   :  { %v59_v23 = vrot.slane %v29_v22, %v58_v20  ;;  %v45_v24 = vrot.slane %v29_v22, %v44_v21  ;;  %s271_s6 = sshll.u32 %s342_s3, 4  ;;  %s272_s6 = int_to_ptr.vmem [resolvable:$true] %s271_s6 }
   0xd   :  { %311 = vset.pattern.permute.xlu1 %v341_v3  ;;  %68 = vperm.xlu0 %309, %v64_v5   ;;  %s316_s8 = scalar_lea.vmem %s272_s6, 16  ;;  %s320_s9 = scalar_lea.vmem %s272_s6, 32 }
   0xe   :  { %73 = vperm.xlu1 %311, %v65_v6   ;;  %p317_p0 = scmp.ne.s32.totalorder %s272_s6, %s316_s8  ;;  %p321_p1 = scmp.lt.s32.totalorder %s272_s6, %s272_s6 }
   0xf   :  { %p322_p2 = scmp.lt.s32.totalorder %s320_s9, %s316_s8 }
  0x11   :  { %90 = vperm.xlu0 %309, %v84_v7   ;;  %p323_p3 = por %p322_p2, %p321_p1 }
  0x12   :  { %95 = vperm.xlu1 %311, %v85_v8  }
  0x13   :  { %p324_p4 = pnand %p323_p3, %p317_p0 }
  0x15   :  { %100 = vperm.xlu0 %309, %v86_v9  }
  0x16   :  { %105 = vperm.xlu1 %311, %v87_v10  }
  0x19   :  { %216 = vperm.xlu0 %309, %v210_v13  }
  0x1a   :  { %221 = vperm.xlu1 %311, %v211_v14  }
  0x1d   :  { %226 = vperm.xlu0 %309, %v212_v15  }
  0x1e   :  { %231 = vperm.xlu1 %311, %v213_v16  }
  0x21   :  { %250 = vperm.xlu0 %309, %v247_v17  }
  0x84   :  { %v50_v25 = vpop.permute.xlu1 %49  ;;  %v35_v26 = vpop.permute.xlu0 %34 }
  0x85   :  { %v60_v27 = vmul.f32 %v59_v23, %v50_v25  ;;  %v46_v28 = vmul.f32 %v45_v24, %v35_v26 }
  0x87   :  { %v62_v33 = vadd.f32 %v60_v27, %v46_v28 }
  0x88   :  { %v54_v29 = vpop.permute.xlu1 %53  ;;  %v40_v30 = vpop.permute.xlu0 %39 }
  0x89   :  { %v61_v31 = vmul.f32 %v59_v23, %v54_v29  ;;  %v47_v32 = vmul.f32 %v45_v24, %v40_v30 }
  0x8b   :  { %v63_v34 = vadd.f32 %v61_v31, %v47_v32 }
  0x8c   :  { %v69_v35 = vpop.permute.xlu0 %68 }
  0x8d   :  { %v76_v36 = vadd.f32 %v69_v35, %v62_v33  ;;  %v74_v37 = vpop.permute.xlu1 %73 }
  0x8e   :  { %v77_v38 = vadd.f32 %v74_v37, %v63_v34 }
  0x8f   :  { %v78_v39 = vmax.f32 %v76_v36, 0.0 }
  0x90   :  { %v79_v40 = vmax.f32 %v77_v38, 0.0  ;;  %v91_v44 = vpop.permute.xlu0 %90 }
  0x91   :  { %v96_v45 = vpop.permute.xlu1 %95 }
  0x92   :  { %v300_v41 = vpack.c.bf16 %v79_v40, %v78_v39 }
  0x94   :  { %301 = vmatprep.subr.bf16.mxu0 %v300_v41  ;;  %304 = vmatprep.subr.bf16.mxu1 %v300_v41  ;;  %v101_v46 = vpop.permute.xlu0 %100 }
  0x95   :  { %303 = vmatpush3.bf16.msra.mxu0 %v300_v41  ;;  %305 = vmatpush3.bf16.msra.mxu1 %v300_v41  ;;  %v106_v47 = vpop.permute.xlu1 %105 }
  0x98   :  { %295 = vmatmul.mubr.msk.f32.vlgmr.msra.gmra.mrb[0].mxu0 %vm108_vm0, %v81_v42  ;;  %298 = vmatmul.mubr.msk.f32.vlgmr.msra.gmra.mrb[0].mxu1 %vm108_vm0, %v83_v43  ;;  %v217_v48 = vpop.permute.xlu0 %216 }
  0x99   :  { %v222_v57 = vpop.permute.xlu1 %221 }
  0x9c   :  { %v227_v0 = vpop.permute.xlu0 %226 }
  0x9d   :  { %v232_v3 = vpop.permute.xlu1 %231 }
  0xa0   :  { %v251_v11 = vpop.permute.xlu0 %250 }
  0xa1   :  { %v256_v13 = vrot.slane %v251_v11, %v44_v21 }
 0x16b   :  { %v296_v49 = vpop.f32.mrb[0].mxu0  ;;  %v299_v50 = vpop.f32.mrb[0].mxu1 }
 0x16c   :  { %v193_v51 = vadd.f32 %v296_v49, %v96_v45  ;;  %v187_v52 = vpop.f32.mrb[1].mxu0  ;;  %v197_v53 = vpop.f32.mrb[1].mxu1  ;;  %v203_v54 = vadd.f32 %v299_v50, %v106_v47 }
 0x16d   :  { %v188_v55 = vadd.f32 %v187_v52, %v91_v44  ;;  %v198_v56 = vadd.f32 %v197_v53, %v101_v46 }
 0x16e   :  { %v207_v58 = vmax.f32 %v193_v51, 0.0  ;;  %v209_v62 = vmax.f32 %v203_v54, 0.0 }
 0x16f   :  { %v206_v59 = vmax.f32 %v188_v55, 0.0  ;;  %v208_v60 = vmax.f32 %v198_v56, 0.0 }
 0x170   :  { %v235_v61 = vmul.f32 %v222_v57, %v207_v58  ;;  %v237_v4 = vmul.f32 %v232_v3, %v209_v62 }
 0x171   :  { %v234_v63 = vmul.f32 %v217_v48, %v206_v59  ;;  %v236_v2 = vmul.f32 %v227_v0, %v208_v60 }
 0x173   :  { %v238_v1 = vadd.f32 %v235_v61, %v234_v63 }
 0x175   :  { %v239_v5 = vadd.f32 %v238_v1, %v236_v2 }
 0x177   :  { %v240_v6 = vadd.f32 %v239_v5, %v237_v4 }
 0x179   :  { %v241_v7 = vrot.slane %v240_v6, 4 }
 0x17b   :  { %v242_v8 = vadd.f32 %v241_v7, %v240_v6 }
 0x17d   :  { %v243_v9 = vrot.slane %v242_v8, 2 }
 0x17f   :  { %v244_v10 = vadd.f32 %v243_v9, %v242_v8 }
 0x181   :  { %v245_v12 = vrot.slane %v244_v10, 1 }
 0x183   :  { %v246_v14 = vadd.f32 %v245_v12, %v244_v10 }
 0x185   :  { %v257_v15 = vadd.f32 %v256_v13, %v246_v14 }
 0x187   :  { %v283_v16 = vmul.f32 -1.442695, %v257_v15 }
 0x189   :  { %312 = vpow2.f32 %v283_v16 }
 0x193   :  { %v313_v17 = vpop.eup %312 }
 0x194   :  { %v261_v18 = vadd.f32 1.0, %v313_v17 }
 0x196   :  { %314 = vrcp.f32 %v261_v18 }
 0x1a0   :  { %v315_v19 = vpop.eup %314 }
 0x1a1   :  { %264 = vst [vmem:[#allocation3] sm:$0x1] %v315_v19 }
 0x1a2   :  { %327 = shalt.err (!%p324_p4)
}
 0x1a3   :  { %s328_s12 = scalar_lea.hbm %s464_s7, 16 }
 0x1a4   :  { %p329_p5 = scmp.ne.s32.totalorder %s464_s7, %s328_s12  ;;  %p332_p6 = scmp.lt.u32.totalorder %s328_s12, %s464_s7 }
 0x1a6   :  { %p334_p7 = pnand %p332_p6, %p329_p5 }
 0x1a8   :  { %337 = shalt.err (!%p334_p7)
}
 0x1a9   :  { %274 = dma.vmem_to_hbm [thread:$0]  %s272_s6, 16, %s464_s7, [#allocation4]  }
 0x1aa   :  { %338 = dma.done.wait [#allocation4], 16  }
 0x1ab   :  { %339 = vsyncadd [#allocation4], 4294967280 }
 0x1ac   :  { %278 = vsyncpa [#allocation4], 1 }

</bundles_post_ra>
